<compile_context>
chip_gen: v5e
topology: v5e:2x2
jax: 0.10.0
libtpu: 0.0.40
codegen_flags: <defaults>
</compile_context>

<pallas_src>
import jax
import jax.numpy as jnp
from jax import lax
from jax.experimental import pallas as pl
from jax.experimental.pallas import tpu as pltpu

# Set to jnp.bfloat16 on v6e/v7x for 2-4x MXU throughput (accumulation stays f32 via
# preferred_element_type); f32 here keeps the small-scale reference checks exact.
COMPUTE_DTYPE = jnp.float32
LANE = 128


# ----------------------------------------------------------------------------
# Fused kernel: per batch element b
#   1) spk = Linear(F.normalize(embedding, dim=1))            (folded in, rsqrt on EUP)
#   2) emb = Embedding(clamp(token, 0)) * pad_mask            (SMEM-prefetch + row gather)
#   3) h   = encoder_proj(emb)                                (lane-padded MXU matmul)
#   4) mu  = nearest time resample of h to T_feat frames      (row copies, no matmul)
# ----------------------------------------------------------------------------
def _fused_kernel(tok_ref, tlen_ref,                       # scalar prefetch (SMEM)
                  spk_ref, table_ref, pw_ref, pb_ref, sw_ref, sb_ref,   # VMEM inputs
                  mu_ref, spk_out_ref,                     # VMEM outputs (lane-padded)
                  emb_sc, h_sc):                           # VMEM scratch
    b = pl.program_id(0)
    V = table_ref.shape[0]
    T_tok = emb_sc.shape[0]
    T_out = mu_ref.shape[0]

    # ---- spk path: F.normalize(dim=1, eps=1e-12) + Linear(E -> n_mels) ----
    x = spk_ref[...]                                                        # (1, E) f32
    inv_norm = lax.rsqrt(jnp.maximum(jnp.sum(x * x, axis=1, keepdims=True), 1e-24))
    xn = (x * inv_norm).astype(COMPUTE_DTYPE)
    spk_out_ref[...] = (
        jnp.dot(xn, sw_ref[...], preferred_element_type=jnp.float32) + sb_ref[...]
    )

    # ---- token embedding: real row gather + pad-mask (no one-hot) ----
    # TODO(synk): PyTorch nn.Embedding raises for token >= vocab_size; we clamp to V-1
    #             to avoid an unchecked OOB VMEM read instead.
    tl = tlen_ref[b]
    # NOTE: T_tok/T_out are tiny & static here; at production lengths, tile the time
    #       axis over the grid (or lax.fori_loop) instead of unrolling.
    for t in range(T_tok):
        tok = jnp.clip(tok_ref[b, t], 0, V - 1)                 # clamp(min=0) + OOB guard
        row = table_ref[pl.ds(tok, 1), :].astype(jnp.float32)   # (1, D) dynamic row gather
        m = (t < tl).astype(jnp.float32)                        # ~make_pad_mask
        emb_sc[t:t + 1, :] = row * m                            # mask multiply in f32 (VPU)

    # TODO(synk): self.encoder is an externally-injected module (e.g. Conformer);
    #             stand-in = identity.

    # ---- encoder_proj: (T_tok, D) @ (D, 128-padded) single lane-dense MXU matmul ----
    h_sc[...] = (
        jnp.dot(emb_sc[...].astype(COMPUTE_DTYPE), pw_ref[...],
                preferred_element_type=jnp.float32)
        + pb_ref[...]
    )

    # TODO(synk): self.length_regulator is an externally-injected module; stand-in =
    #             nearest time resampling of h to the mel-frame length (row copy).
    for t in range(T_out):
        src = (t * T_tok) // T_out            # PyTorch 'nearest': floor(dst*in/out)
        mu_ref[t:t + 1, :] = h_sc[src:src + 1, :]


def fused_flow_frontend(tokens, token_len, spk, table, proj_w, proj_b, spk_w, spk_b,
                        t_feat):
    """Returns (mu (B, t_feat, n_out), spk_embedding (B, n_out))."""
    B, T_tok = tokens.shape
    V, D = table.shape
    E = spk.shape[1]
    n_out = proj_w.shape[1]
    Cp = ((n_out + LANE - 1) // LANE) * LANE          # lane-pad channel dim to 128
    pad = Cp - n_out

    pw = jnp.pad(proj_w, ((0, 0), (0, pad))).astype(COMPUTE_DTYPE)
    pb = jnp.pad(proj_b.reshape(1, n_out), ((0, 0), (0, pad))).astype(jnp.float32)
    sw = jnp.pad(spk_w, ((0, 0), (0, pad))).astype(COMPUTE_DTYPE)
    sb = jnp.pad(spk_b.reshape(1, n_out), ((0, 0), (0, pad))).astype(jnp.float32)
    spk3 = spk.reshape(B, 1, E).astype(jnp.float32)
    table = table.astype(COMPUTE_DTYPE)

    grid_spec = pltpu.PrefetchScalarGridSpec(
        num_scalar_prefetch=2,                         # tokens, token_len -> SMEM
        grid=(B,),
        in_specs=[
            pl.BlockSpec((None, 1, E), lambda b, *_: (b, 0, 0)),    # spk embedding
            pl.BlockSpec((V, D), lambda b, *_: (0, 0)),             # embed table (VMEM-resident)
            pl.BlockSpec((D, Cp), lambda b, *_: (0, 0)),            # proj_w (padded)
            pl.BlockSpec((1, Cp), lambda b, *_: (0, 0)),            # proj_b (padded)
            pl.BlockSpec((E, Cp), lambda b, *_: (0, 0)),            # spk_w  (padded)
            pl.BlockSpec((1, Cp), lambda b, *_: (0, 0)),            # spk_b  (padded)
        ],
        out_specs=[
            pl.BlockSpec((None, t_feat, Cp), lambda b, *_: (b, 0, 0)),  # mu (lane-dense)
            pl.BlockSpec((None, 1, Cp), lambda b, *_: (b, 0, 0)),       # spk out
        ],
        scratch_shapes=[
            pltpu.VMEM((T_tok, D), jnp.float32),       # masked token embeddings
            pltpu.VMEM((T_tok, Cp), jnp.float32),      # h = encoder_proj(emb)
        ],
    )

    mu_p, spk_p = pl.pallas_call(
        _fused_kernel,
        grid_spec=grid_spec,
        out_shape=(
            jax.ShapeDtypeStruct((B, t_feat, Cp), jnp.float32),
            jax.ShapeDtypeStruct((B, 1, Cp), jnp.float32),
        ),
        compiler_params=pltpu.CompilerParams(
            dimension_semantics=("parallel",),          # shard batch across v7x's 2 TCs
            vmem_limit_bytes=32 * 1024 * 1024,          # safe on v5e/v6e/v7x
        ),
    )(tokens.astype(jnp.int32), token_len.astype(jnp.int32),
      spk3, table, pw, pb, sw, sb)

    return mu_p[:, :, :n_out], spk_p[:, 0, :n_out]      # slice off lane padding


# ----------------------------------------------------------------------------
# Forward pass (mirrors DiffWithADVLabel.forward; backward grad hooks are a no-op here).
# ----------------------------------------------------------------------------
def diff_with_adv_label_forward(batch, params):
    feat = batch["speech_feat"]                              # (B, T_feat, n_mels)
    B, T_feat, n_mels = feat.shape

    mu, spk_embedding = fused_flow_frontend(
        batch["speech_token"], batch["speech_token_len"], batch["embedding"],
        params["embed_table"], params["proj_w"], params["proj_b"],
        params["spk_w"], params["spk_b"], t_feat=T_feat)

    # TODO(synk): quantizer.dynamic_quantize + ADV_encoder (EmoMixtureEncoder) are external
    #             modules depending on ADV_bins_file; conds stand-in = zeros.
    conds = jnp.zeros((B, T_feat, n_mels), jnp.float32)

    # mask = (~make_pad_mask(feat_len)).to(h)
    mask = (jnp.arange(T_feat)[None, :] < batch["speech_feat_len"][:, None]).astype(mu.dtype)

    # feat = F.interpolate(feat.unsqueeze(1), size=h.shape[1:], mode='nearest').squeeze(1)
    # h is (T_feat, n_mels) here, so the interpolation is the identity -> no kernel, no copy.
    T_h, C_h = mu.shape[1], mu.shape[2]
    if (T_h, C_h) != (T_feat, n_mels):                       # generic nearest fallback
        ti = (jnp.arange(T_h) * T_feat) // T_h
        ci = (jnp.arange(C_h) * n_mels) // C_h
        feat = feat[:, ti][:, :, ci]

    # TODO(synk): self.decoder.compute_loss (conditional-flow-matching loss) is an external
    #             module; we return exactly the tensors it would consume.
    return {
        "feat": jnp.transpose(feat, (0, 2, 1)),      # (B, 80, T)
        "mask": mask[:, None, :],                    # (B, 1, T)
        "mu": jnp.transpose(mu, (0, 2, 1)),          # (B, 80, T)
        "spks": spk_embedding,                       # (B, 80)
        "cond": jnp.transpose(conds, (0, 2, 1)),     # (B, 80, T)
    }


# ----------------------------------------------------------------------------
# Main
# ----------------------------------------------------------------------------
if __name__ == "__main__":
    B = 2
    T_TOKEN = 8
    T_FEAT = 16
    INPUT_SIZE = 64          # scaled-down from 512
    OUTPUT_SIZE = 80         # num mels
    SPK_EMBED_DIM = 192
    VOCAB_SIZE = 128         # scaled-down from 4096

    key = jax.random.PRNGKey(0)
    k = jax.random.split(key, 10)

    params = {
        "embed_table": jax.random.normal(k[0], (VOCAB_SIZE, INPUT_SIZE), jnp.float32) * 0.02,
        "spk_w": jax.random.normal(k[1], (SPK_EMBED_DIM, OUTPUT_SIZE), jnp.float32) * 0.02,
        "spk_b": jax.random.normal(k[2], (OUTPUT_SIZE,), jnp.float32) * 0.02,
        "proj_w": jax.random.normal(k[3], (INPUT_SIZE, OUTPUT_SIZE), jnp.float32) * 0.02,
        "proj_b": jax.random.normal(k[4], (OUTPUT_SIZE,), jnp.float32) * 0.02,
    }

    batch = {
        "speech_token": jax.random.randint(k[5], (B, T_TOKEN), 0, VOCAB_SIZE, jnp.int32),
        "speech_token_len": jnp.array([T_TOKEN, T_TOKEN - 2], jnp.int32),
        "speech_feat": jax.random.normal(k[6], (B, T_FEAT, OUTPUT_SIZE), jnp.float32),
        "speech_feat_len": jnp.array([T_FEAT, T_FEAT - 4], jnp.int32),
        "embedding": jax.random.normal(k[7], (B, SPK_EMBED_DIM), jnp.float32),
        "ADV": jax.random.uniform(k[8], (B, 3), jnp.float32),        # unused (external quantizer)
        "emo_id": jax.random.randint(k[9], (B,), 0, 10, jnp.int32),  # unused (external ADV_encoder)
    }

    out = diff_with_adv_label_forward(batch, params)
    jax.block_until_ready(out)

    # ---- plain-JAX reference checks ----
    spk = batch["embedding"]
    spk_ref = spk / jnp.maximum(jnp.linalg.norm(spk, axis=1, keepdims=True), 1e-12)
    spk_ref = spk_ref @ params["spk_w"] + params["spk_b"][None, :]
    assert jnp.allclose(out["spks"], spk_ref, atol=1e-3, rtol=1e-2), "spk affine mismatch"

    tok = jnp.clip(batch["speech_token"], 0, VOCAB_SIZE - 1)
    emb = params["embed_table"][tok]
    tmask = (jnp.arange(T_TOKEN)[None, :]
             < batch["speech_token_len"][:, None]).astype(jnp.float32)
    emb = emb * tmask[:, :, None]
    h_ref = jnp.einsum("btd,de->bte", emb, params["proj_w"]) + params["proj_b"][None, None, :]
    src = (jnp.arange(T_FEAT) * T_TOKEN) // T_FEAT               # PyTorch 'nearest'
    mu_ref = jnp.transpose(h_ref[:, src, :], (0, 2, 1))
    assert jnp.allclose(out["mu"], mu_ref, atol=1e-3, rtol=1e-2), "mu mismatch"

    assert out["feat"].shape == (B, OUTPUT_SIZE, T_FEAT)
    assert out["mask"].shape == (B, 1, T_FEAT)
    assert out["cond"].shape == (B, OUTPUT_SIZE, T_FEAT)

    print("KERNEL_OK")
</pallas_src>

<mosaic_0001>
module attributes {stable_mosaic.version = 11 : i64} {
  func.func @_fused_kernel(%arg0: i32, %arg1: memref<2x8xi32, #tpu.memory_space<smem>>, %arg2: memref<2xi32, #tpu.memory_space<smem>>, %arg3: memref<1x1x192xf32, #tpu.memory_space<vmem>>, %arg4: memref<128x64xf32, #tpu.memory_space<vmem>>, %arg5: memref<64x128xf32, #tpu.memory_space<vmem>>, %arg6: memref<1x128xf32, #tpu.memory_space<vmem>>, %arg7: memref<192x128xf32, #tpu.memory_space<vmem>>, %arg8: memref<1x128xf32, #tpu.memory_space<vmem>>, %arg9: memref<1x16x128xf32, #tpu.memory_space<vmem>>, %arg10: memref<1x1x128xf32, #tpu.memory_space<vmem>>, %arg11: memref<8x64xf32, #tpu.memory_space<vmem>>, %arg12: memref<8x128xf32, #tpu.memory_space<vmem>>) attributes {dimension_semantics = [#tpu.dimension_semantics<parallel>], iteration_bounds = array<i64: 2>, scalar_prefetch = 2 : i64, scratch_operands = 2 : i64, tpu.core_type = #tpu.core_type<tc>, window_params = [{transform_indices = @transform_0, window_bounds = array<i64: 1, 1, 192>}, {pipeline_mode = #tpu.pipeline_mode<synchronous>, transform_indices = @transform_1, window_bounds = array<i64: 128, 64>}, {pipeline_mode = #tpu.pipeline_mode<synchronous>, transform_indices = @transform_2, window_bounds = array<i64: 64, 128>}, {pipeline_mode = #tpu.pipeline_mode<synchronous>, transform_indices = @transform_3, window_bounds = array<i64: 1, 128>}, {pipeline_mode = #tpu.pipeline_mode<synchronous>, transform_indices = @transform_4, window_bounds = array<i64: 192, 128>}, {pipeline_mode = #tpu.pipeline_mode<synchronous>, transform_indices = @transform_5, window_bounds = array<i64: 1, 128>}, {transform_indices = @transform_6, window_bounds = array<i64: 1, 16, 128>}, {transform_indices = @transform_7, window_bounds = array<i64: 1, 1, 128>}]} {
    %c0 = arith.constant 0 : index
    %c0_0 = arith.constant 0 : index
    %c0_1 = arith.constant 0 : index
    %0 = vector.load %arg3[%c0, %c0_0, %c0_1] : memref<1x1x192xf32, #tpu.memory_space<vmem>>, vector<1x1x192xf32>
    %1 = vector.shape_cast %0 : vector<1x1x192xf32> to vector<1x192xf32>
    %2 = arith.mulf %1, %1 : vector<1x192xf32>
    %cst = arith.constant dense<0.000000e+00> : vector<1xf32>
    %3 = vector.multi_reduction <add>, %2, %cst [1] : vector<1x192xf32> to vector<1xf32>
    %4 = vector.shape_cast %3 : vector<1xf32> to vector<1x1xf32>
    %cst_2 = arith.constant 1.000000e-24 : f32
    %5 = vector.broadcast %cst_2 : f32 to vector<1x1xf32>
    %6 = arith.maximumf %4, %5 : vector<1x1xf32>
    %7 = math.rsqrt %6 : vector<1x1xf32>
    %8 = vector.broadcast %7 : vector<1x1xf32> to vector<1x192xf32>
    %9 = arith.mulf %1, %8 : vector<1x192xf32>
    %c0_3 = arith.constant 0 : index
    %c0_4 = arith.constant 0 : index
    %10 = vector.load %arg7[%c0_3, %c0_4] : memref<192x128xf32, #tpu.memory_space<vmem>>, vector<192x128xf32>
    %cst_5 = arith.constant dense<0.000000e+00> : vector<1x128xf32>
    %11 = tpu.matmul %9, %10, %cst_5 {dimension_numbers = #tpu.dot_dimension_numbers<[1], [0], [0], [1], [0, 0, 1, 1], [], []>} : vector<1x192xf32>, vector<192x128xf32>, vector<1x128xf32> -> vector<1x128xf32>
    %c0_6 = arith.constant 0 : index
    %c0_7 = arith.constant 0 : index
    %12 = vector.load %arg8[%c0_6, %c0_7] : memref<1x128xf32, #tpu.memory_space<vmem>>, vector<1x128xf32>
    %13 = arith.addf %11, %12 : vector<1x128xf32>
    %c0_8 = arith.constant 0 : index
    %c0_9 = arith.constant 0 : index
    %c0_10 = arith.constant 0 : index
    %14 = vector.load %arg10[%c0_8, %c0_9, %c0_10] : memref<1x1x128xf32, #tpu.memory_space<vmem>>, vector<1x1x128xf32>
    %15 = vector.shape_cast %14 : vector<1x1x128xf32> to vector<1x128xf32>
    %16 = vector.shape_cast %13 : vector<1x128xf32> to vector<1x1x128xf32>
    tpu.vector_store %arg10[%c0_8, %c0_9, %c0_10], %16 {strides = array<i32>} : memref<1x1x128xf32, #tpu.memory_space<vmem>>, vector<1x1x128xf32>,
    %17 = arith.index_cast %arg0 : i32 to index
    %18 = memref.load %arg2[%17] : memref<2xi32, #tpu.memory_space<smem>>
    %19 = arith.index_cast %arg0 : i32 to index
    %c0_11 = arith.constant 0 : index
    %20 = memref.load %arg1[%19, %c0_11] : memref<2x8xi32, #tpu.memory_space<smem>>
    %c0_i32 = arith.constant 0 : i32
    %c127_i32 = arith.constant 127 : i32
    %21 = arith.maxsi %c0_i32, %20 : i32
    %22 = arith.minsi %c127_i32, %21 : i32
    %23 = arith.index_cast %22 : i32 to index
    %c0_12 = arith.constant 0 : index
    %24 = vector.load %arg4[%23, %c0_12] : memref<128x64xf32, #tpu.memory_space<vmem>>, vector<1x64xf32>
    %c0_i32_13 = arith.constant 0 : i32
    %25 = arith.cmpi sgt, %18, %c0_i32_13 : i32
    %26 = arith.extui %25 : i1 to i32
    %27 = arith.sitofp %26 : i32 to f32
    %28 = vector.broadcast %27 : f32 to vector<1x64xf32>
    %29 = arith.mulf %24, %28 : vector<1x64xf32>
    %c0_14 = arith.constant 0 : index
    %c0_15 = arith.constant 0 : index
    %30 = vector.load %arg11[%c0_14, %c0_15] : memref<8x64xf32, #tpu.memory_space<vmem>>, vector<1x64xf32>
    tpu.vector_store %arg11[%c0_14, %c0_15], %29 {strides = array<i32>} : memref<8x64xf32, #tpu.memory_space<vmem>>, vector<1x64xf32>,
    %31 = arith.index_cast %arg0 : i32 to index
    %c1 = arith.constant 1 : index
    %32 = memref.load %arg1[%31, %c1] : memref<2x8xi32, #tpu.memory_space<smem>>
    %c0_i32_16 = arith.constant 0 : i32
    %c127_i32_17 = arith.constant 127 : i32
    %33 = arith.maxsi %c0_i32_16, %32 : i32
    %34 = arith.minsi %c127_i32_17, %33 : i32
    %35 = arith.index_cast %34 : i32 to index
    %c0_18 = arith.constant 0 : index
    %36 = vector.load %arg4[%35, %c0_18] : memref<128x64xf32, #tpu.memory_space<vmem>>, vector<1x64xf32>
    %c1_i32 = arith.constant 1 : i32
    %37 = arith.cmpi sgt, %18, %c1_i32 : i32
    %38 = arith.extui %37 : i1 to i32
    %39 = arith.sitofp %38 : i32 to f32
    %40 = vector.broadcast %39 : f32 to vector<1x64xf32>
    %41 = arith.mulf %36, %40 : vector<1x64xf32>
    %c1_19 = arith.constant 1 : index
    %c0_20 = arith.constant 0 : index
    %42 = vector.load %arg11[%c1_19, %c0_20] : memref<8x64xf32, #tpu.memory_space<vmem>>, vector<1x64xf32>
    tpu.vector_store %arg11[%c1_19, %c0_20], %41 {strides = array<i32>} : memref<8x64xf32, #tpu.memory_space<vmem>>, vector<1x64xf32>,
    %43 = arith.index_cast %arg0 : i32 to index
    %c2 = arith.constant 2 : index
    %44 = memref.load %arg1[%43, %c2] : memref<2x8xi32, #tpu.memory_space<smem>>
    %c0_i32_21 = arith.constant 0 : i32
    %c127_i32_22 = arith.constant 127 : i32
    %45 = arith.maxsi %c0_i32_21, %44 : i32
    %46 = arith.minsi %c127_i32_22, %45 : i32
    %47 = arith.index_cast %46 : i32 to index
    %c0_23 = arith.constant 0 : index
    %48 = vector.load %arg4[%47, %c0_23] : memref<128x64xf32, #tpu.memory_space<vmem>>, vector<1x64xf32>
    %c2_i32 = arith.constant 2 : i32
    %49 = arith.cmpi sgt, %18, %c2_i32 : i32
    %50 = arith.extui %49 : i1 to i32
    %51 = arith.sitofp %50 : i32 to f32
    %52 = vector.broadcast %51 : f32 to vector<1x64xf32>
    %53 = arith.mulf %48, %52 : vector<1x64xf32>
    %c2_24 = arith.constant 2 : index
    %c0_25 = arith.constant 0 : index
    %54 = vector.load %arg11[%c2_24, %c0_25] : memref<8x64xf32, #tpu.memory_space<vmem>>, vector<1x64xf32>
    tpu.vector_store %arg11[%c2_24, %c0_25], %53 {strides = array<i32>} : memref<8x64xf32, #tpu.memory_space<vmem>>, vector<1x64xf32>,
    %55 = arith.index_cast %arg0 : i32 to index
    %c3 = arith.constant 3 : index
    %56 = memref.load %arg1[%55, %c3] : memref<2x8xi32, #tpu.memory_space<smem>>
    %c0_i32_26 = arith.constant 0 : i32
    %c127_i32_27 = arith.constant 127 : i32
    %57 = arith.maxsi %c0_i32_26, %56 : i32
    %58 = arith.minsi %c127_i32_27, %57 : i32
    %59 = arith.index_cast %58 : i32 to index
    %c0_28 = arith.constant 0 : index
    %60 = vector.load %arg4[%59, %c0_28] : memref<128x64xf32, #tpu.memory_space<vmem>>, vector<1x64xf32>
    %c3_i32 = arith.constant 3 : i32
    %61 = arith.cmpi sgt, %18, %c3_i32 : i32
    %62 = arith.extui %61 : i1 to i32
    %63 = arith.sitofp %62 : i32 to f32
    %64 = vector.broadcast %63 : f32 to vector<1x64xf32>
    %65 = arith.mulf %60, %64 : vector<1x64xf32>
    %c3_29 = arith.constant 3 : index
    %c0_30 = arith.constant 0 : index
    %66 = vector.load %arg11[%c3_29, %c0_30] : memref<8x64xf32, #tpu.memory_space<vmem>>, vector<1x64xf32>
    tpu.vector_store %arg11[%c3_29, %c0_30], %65 {strides = array<i32>} : memref<8x64xf32, #tpu.memory_space<vmem>>, vector<1x64xf32>,
    %67 = arith.index_cast %arg0 : i32 to index
    %c4 = arith.constant 4 : index
    %68 = memref.load %arg1[%67, %c4] : memref<2x8xi32, #tpu.memory_space<smem>>
    %c0_i32_31 = arith.constant 0 : i32
    %c127_i32_32 = arith.constant 127 : i32
    %69 = arith.maxsi %c0_i32_31, %68 : i32
    %70 = arith.minsi %c127_i32_32, %69 : i32
    %71 = arith.index_cast %70 : i32 to index
    %c0_33 = arith.constant 0 : index
    %72 = vector.load %arg4[%71, %c0_33] : memref<128x64xf32, #tpu.memory_space<vmem>>, vector<1x64xf32>
    %c4_i32 = arith.constant 4 : i32
    %73 = arith.cmpi sgt, %18, %c4_i32 : i32
    %74 = arith.extui %73 : i1 to i32
    %75 = arith.sitofp %74 : i32 to f32
    %76 = vector.broadcast %75 : f32 to vector<1x64xf32>
    %77 = arith.mulf %72, %76 : vector<1x64xf32>
    %c4_34 = arith.constant 4 : index
    %c0_35 = arith.constant 0 : index
    %78 = vector.load %arg11[%c4_34, %c0_35] : memref<8x64xf32, #tpu.memory_space<vmem>>, vector<1x64xf32>
    tpu.vector_store %arg11[%c4_34, %c0_35], %77 {strides = array<i32>} : memref<8x64xf32, #tpu.memory_space<vmem>>, vector<1x64xf32>,
    %79 = arith.index_cast %arg0 : i32 to index
    %c5 = arith.constant 5 : index
    %80 = memref.load %arg1[%79, %c5] : memref<2x8xi32, #tpu.memory_space<smem>>
    %c0_i32_36 = arith.constant 0 : i32
    %c127_i32_37 = arith.constant 127 : i32
    %81 = arith.maxsi %c0_i32_36, %80 : i32
    %82 = arith.minsi %c127_i32_37, %81 : i32
    %83 = arith.index_cast %82 : i32 to index
    %c0_38 = arith.constant 0 : index
    %84 = vector.load %arg4[%83, %c0_38] : memref<128x64xf32, #tpu.memory_space<vmem>>, vector<1x64xf32>
    %c5_i32 = arith.constant 5 : i32
    %85 = arith.cmpi sgt, %18, %c5_i32 : i32
    %86 = arith.extui %85 : i1 to i32
    %87 = arith.sitofp %86 : i32 to f32
    %88 = vector.broadcast %87 : f32 to vector<1x64xf32>
    %89 = arith.mulf %84, %88 : vector<1x64xf32>
    %c5_39 = arith.constant 5 : index
    %c0_40 = arith.constant 0 : index
    %90 = vector.load %arg11[%c5_39, %c0_40] : memref<8x64xf32, #tpu.memory_space<vmem>>, vector<1x64xf32>
    tpu.vector_store %arg11[%c5_39, %c0_40], %89 {strides = array<i32>} : memref<8x64xf32, #tpu.memory_space<vmem>>, vector<1x64xf32>,
    %91 = arith.index_cast %arg0 : i32 to index
    %c6 = arith.constant 6 : index
    %92 = memref.load %arg1[%91, %c6] : memref<2x8xi32, #tpu.memory_space<smem>>
    %c0_i32_41 = arith.constant 0 : i32
    %c127_i32_42 = arith.constant 127 : i32
    %93 = arith.maxsi %c0_i32_41, %92 : i32
    %94 = arith.minsi %c127_i32_42, %93 : i32
    %95 = arith.index_cast %94 : i32 to index
    %c0_43 = arith.constant 0 : index
    %96 = vector.load %arg4[%95, %c0_43] : memref<128x64xf32, #tpu.memory_space<vmem>>, vector<1x64xf32>
    %c6_i32 = arith.constant 6 : i32
    %97 = arith.cmpi sgt, %18, %c6_i32 : i32
    %98 = arith.extui %97 : i1 to i32
    %99 = arith.sitofp %98 : i32 to f32
    %100 = vector.broadcast %99 : f32 to vector<1x64xf32>
    %101 = arith.mulf %96, %100 : vector<1x64xf32>
    %c6_44 = arith.constant 6 : index
    %c0_45 = arith.constant 0 : index
    %102 = vector.load %arg11[%c6_44, %c0_45] : memref<8x64xf32, #tpu.memory_space<vmem>>, vector<1x64xf32>
    tpu.vector_store %arg11[%c6_44, %c0_45], %101 {strides = array<i32>} : memref<8x64xf32, #tpu.memory_space<vmem>>, vector<1x64xf32>,
    %103 = arith.index_cast %arg0 : i32 to index
    %c7 = arith.constant 7 : index
    %104 = memref.load %arg1[%103, %c7] : memref<2x8xi32, #tpu.memory_space<smem>>
    %c0_i32_46 = arith.constant 0 : i32
    %c127_i32_47 = arith.constant 127 : i32
    %105 = arith.maxsi %c0_i32_46, %104 : i32
    %106 = arith.minsi %c127_i32_47, %105 : i32
    %107 = arith.index_cast %106 : i32 to index
    %c0_48 = arith.constant 0 : index
    %108 = vector.load %arg4[%107, %c0_48] : memref<128x64xf32, #tpu.memory_space<vmem>>, vector<1x64xf32>
    %c7_i32 = arith.constant 7 : i32
    %109 = arith.cmpi sgt, %18, %c7_i32 : i32
    %110 = arith.extui %109 : i1 to i32
    %111 = arith.sitofp %110 : i32 to f32
    %112 = vector.broadcast %111 : f32 to vector<1x64xf32>
    %113 = arith.mulf %108, %112 : vector<1x64xf32>
    %c7_49 = arith.constant 7 : index
    %c0_50 = arith.constant 0 : index
    %114 = vector.load %arg11[%c7_49, %c0_50] : memref<8x64xf32, #tpu.memory_space<vmem>>, vector<1x64xf32>
    tpu.vector_store %arg11[%c7_49, %c0_50], %113 {strides = array<i32>} : memref<8x64xf32, #tpu.memory_space<vmem>>, vector<1x64xf32>,
    %c0_51 = arith.constant 0 : index
    %c0_52 = arith.constant 0 : index
    %115 = vector.load %arg11[%c0_51, %c0_52] : memref<8x64xf32, #tpu.memory_space<vmem>>, vector<8x64xf32>
    %c0_53 = arith.constant 0 : index
    %c0_54 = arith.constant 0 : index
    %116 = vector.load %arg5[%c0_53, %c0_54] : memref<64x128xf32, #tpu.memory_space<vmem>>, vector<64x128xf32>
    %cst_55 = arith.constant dense<0.000000e+00> : vector<8x128xf32>
    %117 = tpu.matmul %115, %116, %cst_55 {dimension_numbers = #tpu.dot_dimension_numbers<[1], [0], [0], [1], [0, 0, 1, 1], [], []>} : vector<8x64xf32>, vector<64x128xf32>, vector<8x128xf32> -> vector<8x128xf32>
    %c0_56 = arith.constant 0 : index
    %c0_57 = arith.constant 0 : index
    %118 = vector.load %arg6[%c0_56, %c0_57] : memref<1x128xf32, #tpu.memory_space<vmem>>, vector<1x128xf32>
    %119 = vector.broadcast %118 : vector<1x128xf32> to vector<8x128xf32>
    %120 = arith.addf %117, %119 : vector<8x128xf32>
    %c0_58 = arith.constant 0 : index
    %c0_59 = arith.constant 0 : index
    %121 = vector.load %arg12[%c0_58, %c0_59] : memref<8x128xf32, #tpu.memory_space<vmem>>, vector<8x128xf32>
    tpu.vector_store %arg12[%c0_58, %c0_59], %120 {strides = array<i32>} : memref<8x128xf32, #tpu.memory_space<vmem>>, vector<8x128xf32>,
    %c0_60 = arith.constant 0 : index
    %c0_61 = arith.constant 0 : index
    %122 = vector.load %arg12[%c0_60, %c0_61] : memref<8x128xf32, #tpu.memory_space<vmem>>, vector<1x128xf32>
    %c0_62 = arith.constant 0 : index
    %c0_63 = arith.constant 0 : index
    %c0_64 = arith.constant 0 : index
    %123 = vector.load %arg9[%c0_62, %c0_63, %c0_64] : memref<1x16x128xf32, #tpu.memory_space<vmem>>, vector<1x1x128xf32>
    %124 = vector.shape_cast %123 : vector<1x1x128xf32> to vector<1x128xf32>
    %125 = vector.shape_cast %122 : vector<1x128xf32> to vector<1x1x128xf32>
    tpu.vector_store %arg9[%c0_62, %c0_63, %c0_64], %125 {strides = array<i32>} : memref<1x16x128xf32, #tpu.memory_space<vmem>>, vector<1x1x128xf32>,
    %c0_65 = arith.constant 0 : index
    %c0_66 = arith.constant 0 : index
    %126 = vector.load %arg12[%c0_65, %c0_66] : memref<8x128xf32, #tpu.memory_space<vmem>>, vector<1x128xf32>
    %c0_67 = arith.constant 0 : index
    %c1_68 = arith.constant 1 : index
    %c0_69 = arith.constant 0 : index
    %127 = vector.load %arg9[%c0_67, %c1_68, %c0_69] : memref<1x16x128xf32, #tpu.memory_space<vmem>>, vector<1x1x128xf32>
    %128 = vector.shape_cast %127 : vector<1x1x128xf32> to vector<1x128xf32>
    %129 = vector.shape_cast %126 : vector<1x128xf32> to vector<1x1x128xf32>
    tpu.vector_store %arg9[%c0_67, %c1_68, %c0_69], %129 {strides = array<i32>} : memref<1x16x128xf32, #tpu.memory_space<vmem>>, vector<1x1x128xf32>,
    %c1_70 = arith.constant 1 : index
    %c0_71 = arith.constant 0 : index
    %130 = vector.load %arg12[%c1_70, %c0_71] : memref<8x128xf32, #tpu.memory_space<vmem>>, vector<1x128xf32>
    %c0_72 = arith.constant 0 : index
    %c2_73 = arith.constant 2 : index
    %c0_74 = arith.constant 0 : index
    %131 = vector.load %arg9[%c0_72, %c2_73, %c0_74] : memref<1x16x128xf32, #tpu.memory_space<vmem>>, vector<1x1x128xf32>
    %132 = vector.shape_cast %131 : vector<1x1x128xf32> to vector<1x128xf32>
    %133 = vector.shape_cast %130 : vector<1x128xf32> to vector<1x1x128xf32>
    tpu.vector_store %arg9[%c0_72, %c2_73, %c0_74], %133 {strides = array<i32>} : memref<1x16x128xf32, #tpu.memory_space<vmem>>, vector<1x1x128xf32>,
    %c1_75 = arith.constant 1 : index
    %c0_76 = arith.constant 0 : index
    %134 = vector.load %arg12[%c1_75, %c0_76] : memref<8x128xf32, #tpu.memory_space<vmem>>, vector<1x128xf32>
    %c0_77 = arith.constant 0 : index
    %c3_78 = arith.constant 3 : index
    %c0_79 = arith.constant 0 : index
    %135 = vector.load %arg9[%c0_77, %c3_78, %c0_79] : memref<1x16x128xf32, #tpu.memory_space<vmem>>, vector<1x1x128xf32>
    %136 = vector.shape_cast %135 : vector<1x1x128xf32> to vector<1x128xf32>
    %137 = vector.shape_cast %134 : vector<1x128xf32> to vector<1x1x128xf32>
    tpu.vector_store %arg9[%c0_77, %c3_78, %c0_79], %137 {strides = array<i32>} : memref<1x16x128xf32, #tpu.memory_space<vmem>>, vector<1x1x128xf32>,
    %c2_80 = arith.constant 2 : index
    %c0_81 = arith.constant 0 : index
    %138 = vector.load %arg12[%c2_80, %c0_81] : memref<8x128xf32, #tpu.memory_space<vmem>>, vector<1x128xf32>
    %c0_82 = arith.constant 0 : index
    %c4_83 = arith.constant 4 : index
    %c0_84 = arith.constant 0 : index
    %139 = vector.load %arg9[%c0_82, %c4_83, %c0_84] : memref<1x16x128xf32, #tpu.memory_space<vmem>>, vector<1x1x128xf32>
    %140 = vector.shape_cast %139 : vector<1x1x128xf32> to vector<1x128xf32>
    %141 = vector.shape_cast %138 : vector<1x128xf32> to vector<1x1x128xf32>
    tpu.vector_store %arg9[%c0_82, %c4_83, %c0_84], %141 {strides = array<i32>} : memref<1x16x128xf32, #tpu.memory_space<vmem>>, vector<1x1x128xf32>,
    %c2_85 = arith.constant 2 : index
    %c0_86 = arith.constant 0 : index
    %142 = vector.load %arg12[%c2_85, %c0_86] : memref<8x128xf32, #tpu.memory_space<vmem>>, vector<1x128xf32>
    %c0_87 = arith.constant 0 : index
    %c5_88 = arith.constant 5 : index
    %c0_89 = arith.constant 0 : index
    %143 = vector.load %arg9[%c0_87, %c5_88, %c0_89] : memref<1x16x128xf32, #tpu.memory_space<vmem>>, vector<1x1x128xf32>
    %144 = vector.shape_cast %143 : vector<1x1x128xf32> to vector<1x128xf32>
    %145 = vector.shape_cast %142 : vector<1x128xf32> to vector<1x1x128xf32>
    tpu.vector_store %arg9[%c0_87, %c5_88, %c0_89], %145 {strides = array<i32>} : memref<1x16x128xf32, #tpu.memory_space<vmem>>, vector<1x1x128xf32>,
    %c3_90 = arith.constant 3 : index
    %c0_91 = arith.constant 0 : index
    %146 = vector.load %arg12[%c3_90, %c0_91] : memref<8x128xf32, #tpu.memory_space<vmem>>, vector<1x128xf32>
    %c0_92 = arith.constant 0 : index
    %c6_93 = arith.constant 6 : index
    %c0_94 = arith.constant 0 : index
    %147 = vector.load %arg9[%c0_92, %c6_93, %c0_94] : memref<1x16x128xf32, #tpu.memory_space<vmem>>, vector<1x1x128xf32>
    %148 = vector.shape_cast %147 : vector<1x1x128xf32> to vector<1x128xf32>
    %149 = vector.shape_cast %146 : vector<1x128xf32> to vector<1x1x128xf32>
    tpu.vector_store %arg9[%c0_92, %c6_93, %c0_94], %149 {strides = array<i32>} : memref<1x16x128xf32, #tpu.memory_space<vmem>>, vector<1x1x128xf32>,
    %c3_95 = arith.constant 3 : index
    %c0_96 = arith.constant 0 : index
    %150 = vector.load %arg12[%c3_95, %c0_96] : memref<8x128xf32, #tpu.memory_space<vmem>>, vector<1x128xf32>
    %c0_97 = arith.constant 0 : index
    %c7_98 = arith.constant 7 : index
    %c0_99 = arith.constant 0 : index
    %151 = vector.load %arg9[%c0_97, %c7_98, %c0_99] : memref<1x16x128xf32, #tpu.memory_space<vmem>>, vector<1x1x128xf32>
    %152 = vector.shape_cast %151 : vector<1x1x128xf32> to vector<1x128xf32>
    %153 = vector.shape_cast %150 : vector<1x128xf32> to vector<1x1x128xf32>
    tpu.vector_store %arg9[%c0_97, %c7_98, %c0_99], %153 {strides = array<i32>} : memref<1x16x128xf32, #tpu.memory_space<vmem>>, vector<1x1x128xf32>,
    %c4_100 = arith.constant 4 : index
    %c0_101 = arith.constant 0 : index
    %154 = vector.load %arg12[%c4_100, %c0_101] : memref<8x128xf32, #tpu.memory_space<vmem>>, vector<1x128xf32>
    %c0_102 = arith.constant 0 : index
    %c8 = arith.constant 8 : index
    %c0_103 = arith.constant 0 : index
    %155 = vector.load %arg9[%c0_102, %c8, %c0_103] : memref<1x16x128xf32, #tpu.memory_space<vmem>>, vector<1x1x128xf32>
    %156 = vector.shape_cast %155 : vector<1x1x128xf32> to vector<1x128xf32>
    %157 = vector.shape_cast %154 : vector<1x128xf32> to vector<1x1x128xf32>
    tpu.vector_store %arg9[%c0_102, %c8, %c0_103], %157 {strides = array<i32>} : memref<1x16x128xf32, #tpu.memory_space<vmem>>, vector<1x1x128xf32>,
    %c4_104 = arith.constant 4 : index
    %c0_105 = arith.constant 0 : index
    %158 = vector.load %arg12[%c4_104, %c0_105] : memref<8x128xf32, #tpu.memory_space<vmem>>, vector<1x128xf32>
    %c0_106 = arith.constant 0 : index
    %c9 = arith.constant 9 : index
    %c0_107 = arith.constant 0 : index
    %159 = vector.load %arg9[%c0_106, %c9, %c0_107] : memref<1x16x128xf32, #tpu.memory_space<vmem>>, vector<1x1x128xf32>
    %160 = vector.shape_cast %159 : vector<1x1x128xf32> to vector<1x128xf32>
    %161 = vector.shape_cast %158 : vector<1x128xf32> to vector<1x1x128xf32>
    tpu.vector_store %arg9[%c0_106, %c9, %c0_107], %161 {strides = array<i32>} : memref<1x16x128xf32, #tpu.memory_space<vmem>>, vector<1x1x128xf32>,
    %c5_108 = arith.constant 5 : index
    %c0_109 = arith.constant 0 : index
    %162 = vector.load %arg12[%c5_108, %c0_109] : memref<8x128xf32, #tpu.memory_space<vmem>>, vector<1x128xf32>
    %c0_110 = arith.constant 0 : index
    %c10 = arith.constant 10 : index
    %c0_111 = arith.constant 0 : index
    %163 = vector.load %arg9[%c0_110, %c10, %c0_111] : memref<1x16x128xf32, #tpu.memory_space<vmem>>, vector<1x1x128xf32>
    %164 = vector.shape_cast %163 : vector<1x1x128xf32> to vector<1x128xf32>
    %165 = vector.shape_cast %162 : vector<1x128xf32> to vector<1x1x128xf32>
    tpu.vector_store %arg9[%c0_110, %c10, %c0_111], %165 {strides = array<i32>} : memref<1x16x128xf32, #tpu.memory_space<vmem>>, vector<1x1x128xf32>,
    %c5_112 = arith.constant 5 : index
    %c0_113 = arith.constant 0 : index
    %166 = vector.load %arg12[%c5_112, %c0_113] : memref<8x128xf32, #tpu.memory_space<vmem>>, vector<1x128xf32>
    %c0_114 = arith.constant 0 : index
    %c11 = arith.constant 11 : index
    %c0_115 = arith.constant 0 : index
    %167 = vector.load %arg9[%c0_114, %c11, %c0_115] : memref<1x16x128xf32, #tpu.memory_space<vmem>>, vector<1x1x128xf32>
    %168 = vector.shape_cast %167 : vector<1x1x128xf32> to vector<1x128xf32>
    %169 = vector.shape_cast %166 : vector<1x128xf32> to vector<1x1x128xf32>
    tpu.vector_store %arg9[%c0_114, %c11, %c0_115], %169 {strides = array<i32>} : memref<1x16x128xf32, #tpu.memory_space<vmem>>, vector<1x1x128xf32>,
    %c6_116 = arith.constant 6 : index
    %c0_117 = arith.constant 0 : index
    %170 = vector.load %arg12[%c6_116, %c0_117] : memref<8x128xf32, #tpu.memory_space<vmem>>, vector<1x128xf32>
    %c0_118 = arith.constant 0 : index
    %c12 = arith.constant 12 : index
    %c0_119 = arith.constant 0 : index
    %171 = vector.load %arg9[%c0_118, %c12, %c0_119] : memref<1x16x128xf32, #tpu.memory_space<vmem>>, vector<1x1x128xf32>
    %172 = vector.shape_cast %171 : vector<1x1x128xf32> to vector<1x128xf32>
    %173 = vector.shape_cast %170 : vector<1x128xf32> to vector<1x1x128xf32>
    tpu.vector_store %arg9[%c0_118, %c12, %c0_119], %173 {strides = array<i32>} : memref<1x16x128xf32, #tpu.memory_space<vmem>>, vector<1x1x128xf32>,
    %c6_120 = arith.constant 6 : index
    %c0_121 = arith.constant 0 : index
    %174 = vector.load %arg12[%c6_120, %c0_121] : memref<8x128xf32, #tpu.memory_space<vmem>>, vector<1x128xf32>
    %c0_122 = arith.constant 0 : index
    %c13 = arith.constant 13 : index
    %c0_123 = arith.constant 0 : index
    %175 = vector.load %arg9[%c0_122, %c13, %c0_123] : memref<1x16x128xf32, #tpu.memory_space<vmem>>, vector<1x1x128xf32>
    %176 = vector.shape_cast %175 : vector<1x1x128xf32> to vector<1x128xf32>
    %177 = vector.shape_cast %174 : vector<1x128xf32> to vector<1x1x128xf32>
    tpu.vector_store %arg9[%c0_122, %c13, %c0_123], %177 {strides = array<i32>} : memref<1x16x128xf32, #tpu.memory_space<vmem>>, vector<1x1x128xf32>,
    %c7_124 = arith.constant 7 : index
    %c0_125 = arith.constant 0 : index
    %178 = vector.load %arg12[%c7_124, %c0_125] : memref<8x128xf32, #tpu.memory_space<vmem>>, vector<1x128xf32>
    %c0_126 = arith.constant 0 : index
    %c14 = arith.constant 14 : index
    %c0_127 = arith.constant 0 : index
    %179 = vector.load %arg9[%c0_126, %c14, %c0_127] : memref<1x16x128xf32, #tpu.memory_space<vmem>>, vector<1x1x128xf32>
    %180 = vector.shape_cast %179 : vector<1x1x128xf32> to vector<1x128xf32>
    %181 = vector.shape_cast %178 : vector<1x128xf32> to vector<1x1x128xf32>
    tpu.vector_store %arg9[%c0_126, %c14, %c0_127], %181 {strides = array<i32>} : memref<1x16x128xf32, #tpu.memory_space<vmem>>, vector<1x1x128xf32>,
    %c7_128 = arith.constant 7 : index
    %c0_129 = arith.constant 0 : index
    %182 = vector.load %arg12[%c7_128, %c0_129] : memref<8x128xf32, #tpu.memory_space<vmem>>, vector<1x128xf32>
    %c0_130 = arith.constant 0 : index
    %c15 = arith.constant 15 : index
    %c0_131 = arith.constant 0 : index
    %183 = vector.load %arg9[%c0_130, %c15, %c0_131] : memref<1x16x128xf32, #tpu.memory_space<vmem>>, vector<1x1x128xf32>
    %184 = vector.shape_cast %183 : vector<1x1x128xf32> to vector<1x128xf32>
    %185 = vector.shape_cast %182 : vector<1x128xf32> to vector<1x1x128xf32>
    tpu.vector_store %arg9[%c0_130, %c15, %c0_131], %185 {strides = array<i32>} : memref<1x16x128xf32, #tpu.memory_space<vmem>>, vector<1x1x128xf32>,
    return
  }
  func.func @transform_0(%arg0: i32, %arg1: memref<2x8xi32, #tpu.memory_space<smem>>, %arg2: memref<2xi32, #tpu.memory_space<smem>>) -> (i32, i32, i32) {
    %c0_i32 = arith.constant 0 : i32
    %c0_i32_0 = arith.constant 0 : i32
    %c0_i32_1 = arith.constant 0 : i32
    return %arg0, %c0_i32, %c0_i32_0 : i32, i32, i32
  }
  func.func @transform_1(%arg0: i32, %arg1: memref<2x8xi32, #tpu.memory_space<smem>>, %arg2: memref<2xi32, #tpu.memory_space<smem>>) -> (i32, i32) {
    %c0_i32 = arith.constant 0 : i32
    %c0_i32_0 = arith.constant 0 : i32
    %c0_i32_1 = arith.constant 0 : i32
    return %c0_i32, %c0_i32_0 : i32, i32
  }
  func.func @transform_2(%arg0: i32, %arg1: memref<2x8xi32, #tpu.memory_space<smem>>, %arg2: memref<2xi32, #tpu.memory_space<smem>>) -> (i32, i32) {
    %c0_i32 = arith.constant 0 : i32
    %c0_i32_0 = arith.constant 0 : i32
    %c0_i32_1 = arith.constant 0 : i32
    return %c0_i32, %c0_i32_0 : i32, i32
  }
  func.func @transform_3(%arg0: i32, %arg1: memref<2x8xi32, #tpu.memory_space<smem>>, %arg2: memref<2xi32, #tpu.memory_space<smem>>) -> (i32, i32) {
    %c0_i32 = arith.constant 0 : i32
    %c0_i32_0 = arith.constant 0 : i32
    %c0_i32_1 = arith.constant 0 : i32
    return %c0_i32, %c0_i32_0 : i32, i32
  }
  func.func @transform_4(%arg0: i32, %arg1: memref<2x8xi32, #tpu.memory_space<smem>>, %arg2: memref<2xi32, #tpu.memory_space<smem>>) -> (i32, i32) {
    %c0_i32 = arith.constant 0 : i32
    %c0_i32_0 = arith.constant 0 : i32
    %c0_i32_1 = arith.constant 0 : i32
    return %c0_i32, %c0_i32_0 : i32, i32
  }
  func.func @transform_5(%arg0: i32, %arg1: memref<2x8xi32, #tpu.memory_space<smem>>, %arg2: memref<2xi32, #tpu.memory_space<smem>>) -> (i32, i32) {
    %c0_i32 = arith.constant 0 : i32
    %c0_i32_0 = arith.constant 0 : i32
    %c0_i32_1 = arith.constant 0 : i32
    return %c0_i32, %c0_i32_0 : i32, i32
  }
  func.func @transform_6(%arg0: i32, %arg1: memref<2x8xi32, #tpu.memory_space<smem>>, %arg2: memref<2xi32, #tpu.memory_space<smem>>) -> (i32, i32, i32) {
    %c0_i32 = arith.constant 0 : i32
    %c0_i32_0 = arith.constant 0 : i32
    %c0_i32_1 = arith.constant 0 : i32
    return %arg0, %c0_i32, %c0_i32_0 : i32, i32, i32
  }
  func.func @transform_7(%arg0: i32, %arg1: memref<2x8xi32, #tpu.memory_space<smem>>, %arg2: memref<2xi32, #tpu.memory_space<smem>>) -> (i32, i32, i32) {
    %c0_i32 = arith.constant 0 : i32
    %c0_i32_0 = arith.constant 0 : i32
    %c0_i32_1 = arith.constant 0 : i32
    return %arg0, %c0_i32, %c0_i32_0 : i32, i32, i32
  }
}

</mosaic_0001>

<bundles_post_ra>
// kernel: tpu_custom_call.1
= control target key start
LH: loop header
LB: loop body
LE: loop exit
PB: predicated region body
PF: predicated region fallthrough
CT: control target
= control target key end

     0   :  { %s1172_s15 = smov [#allocation5]   ;;  %s1173_s16 = smov [#allocation6]   ;;  %s1601_s0 = inlined_call_operand.hbm [shape: s32[2,8], index: 0, kind: input, shape index: {}]   ;;  %s1602_s2 = inlined_call_operand.vmem [shape: f32[2,1,192], index: 2, kind: input, shape index: {}]   ;;  %s1603_s3 = inlined_call_operand.vmem [shape: f32[128,64], index: 3, kind: input, shape index: {}]   ;;  %s1604_s4 = inlined_call_operand.hbm [shape: f32[64,128], index: 4, kind: input, shape index: {}]   ;;  %s1605_s5 = inlined_call_operand.hbm [shape: f32[1,128], index: 5, kind: input, shape index: {}]   ;;  %s1606_s6 = inlined_call_operand.vmem [shape: f32[192,128], index: 6, kind: input, shape index: {}]   ;;  %s1607_s7 = inlined_call_operand.hbm [shape: f32[1,128], index: 7, kind: input, shape index: {}]   ;;  %s1608_s8 = inlined_call_operand.hbm [shape: f32[2,16,128], index: 8, kind: output, shape index: {0}]   ;;  %s1609_s9 = inlined_call_operand.hbm [shape: f32[2,1,128], index: 9, kind: output, shape index: {1}]   ;;  %s1610_s1 = inlined_call_operand.vmem [shape: s32[2], index: 1, kind: input, shape index: {}]  }
   0x1   :  { %1624 = sst [smem:[#allocation30_spill]] %s1602_s2  ;;  %s16_s11 = sshll.u32 %s1601_s0, 4  ;;  %s17_s11 = int_to_ptr.hbm [resolvable:$true] %s16_s11 }
   0x2   :  { %1625 = sst [smem:[#allocation31_spill]] %s1604_s4  ;;  %s21_s14 = sshll.u32 %s1610_s1, 4  ;;  %s22_s14 = int_to_ptr.vmem [resolvable:$true] %s21_s14 }
   0x3   :  { %1626 = sst [smem:[#allocation32_spill]] %s1605_s5 }
   0x4   :  { %1627 = sst [smem:[#allocation33_spill]] %s1607_s7 }
   0x5   :  { %1628 = sst [smem:[#allocation34_spill]] %s1608_s8 }
   0x6   :  { %1629 = sst [smem:[#allocation35_spill]] %s1609_s9 }
   0x7   :  { %19 = dma.hbm_to_smem %s17_s11, 32, %s1172_s15, [#allocation4] }
   0x8   :  { %24 = dma.vmem_to_smem %s22_s14, 16, %s1173_s16, [#allocation4] }
   0x9   :  { %1138 = dma.done.wait [#allocation4], 48 }
   0xa   :  { %1139 = vsyncadd [#allocation4], 4294967248 }
   0xb   :  { %27 = sfence }
   0xc   :  { %28 = vsyncpa [#allocation8], 0 }
   0xd   :  { %29 = vsyncpa [#allocation11], 0 }
   0xe   :  { %30 = vsyncpa [#allocation9], 0 }
   0xf   :  { %32 = vsyncpa [#allocation9 + $0x1], 0 }
  0x10   :  { %33 = vsyncpa [#allocation15], 0 }
  0x11   :  { %35 = vsyncpa [#allocation15 + $0x1], 0  ;;  %s1237_s0 = smov 0   ;;  %s1239_s17 = smov 0  }
  0x12   :  { %s1241_s1 = smov 0   ;;  %s1243_s18 = smov 0  }
  0x13 LB: > { %1630 = sst [smem:[#allocation21_spill]] %s1158_s0  ;;  %s1258_s19 = sadd.s32 4294967295, %s1170_s18   ;;  %s1170_s18 = sphi %s1243_s18, %s1666_s18   ;;  %s1166_s1 = sphi %s1241_s1, %s1669_s1   ;;  %s1162_s17 = sphi %s1239_s17, %s1668_s17   ;;  %s1158_s0 = sphi %s1237_s0, %s1667_s0  }
  0x14   : > { %1631 = sst [smem:[#allocation22_spill]] %s1162_s17  ;;  %s791_s20 = sadd.s32 4294967294, %s1170_s18  }
  0x15   : > { %1632 = sst [smem:[#allocation23_spill]] %s1166_s1  ;;  %s1262_s21 = sadd.s32 1, %s1170_s18  }
  0x16   : > { %1633 = sst [smem:[#allocation24_spill]] %s1170_s18  ;;  %s179_s22 = sadd.s32 1, %s1166_s1 }
  0x17   : > { %1634 = sst [smem:[#allocation25_spill]] %s1258_s19  ;;  %s176_s23 = ssub.s32 %s1170_s18, %s1262_s21 }
  0x18   : > { %1635 = sst [smem:[#allocation26_spill]] %s1262_s21  ;;  %p189_p0 = scmp.ne.s32.totalorder %s1166_s1, %s1162_s17 }
  0x19   : > { %p177_p1 = scmp.eq.s32.totalorder %s176_s23, 0  ;;  %p190_p2 = scmp.eq.s32.totalorder %s1258_s19, 1 }
  0x1a   : > { %p195_p3 = scmp.ne.s32.totalorder %s1162_s17, %s1158_s0  ;;  %p196_p4 = scmp.eq.s32.totalorder %s791_s20, 1 }
  0x1b   : > { %s1273_s24 = scalar_select %p177_p1, %s1166_s1, %s179_s22  }
  0x1c   : > { %p1275_p5 = por %p190_p2, %p189_p0  ;;  %p1279_p6 = por %p196_p4, %p195_p3 }
  0x1d   : > { %1636 = sst [smem:[#allocation27_spill]] %s1273_s24  ;;  %p792_p7 = scmp.ge.s32.totalorder %s1170_s18, 1 }
  0x1e   : > { %s1637_s25 = scalar_select %p1275_p5, 1, 0 }
  0x1f   : > { %s1639_s26 = scalar_select %p1279_p6, 1, 0 }
  0x20   : > { %1638 = sst [smem:[#allocation28_spill]] %s1637_s25  ;;  %p229_p8 = scmp.lt.s32.totalorder %s1170_s18, 3 }
  0x21   : > { %1640 = sst [smem:[#allocation29_spill]] %s1639_s26  ;;  %p901_p9 = scmp.eq.s32.totalorder %s1258_s19, 0 }
  0x22   : > { %p1286_p10 = pnand %p792_p7, %p229_p8  ;;  %s1642_s5 = sld [smem:[#allocation32_spill]] }
  0x23   : > { %s1174_s10 = smov [#allocation10]   ;;  %s1643_s4 = sld [smem:[#allocation31_spill]] }
  0x24   : > { %p884_p11 = pneg %p1286_p10  ;;  %s260_s11 = sshll.u32 %s1174_s10, 4  ;;  %s261_s11 = int_to_ptr.vmem [resolvable:$true] %s260_s11 }
  0x25   : > { %s1175_s16 = smov [#allocation7]   ;;  %s1176_s22 = smov 128  }
  0x26   : > { %p1300_p12 = pnand %p901_p9, %p884_p11  ;;  %s245_s20 = sshll.u32 %s1175_s16, 4  ;;  %s246_s20 = int_to_ptr.vmem [resolvable:$true] %s245_s20 }
  0x27   : > { %s1177_s23 = smov 8   ;;  %s1645_s7 = sld [smem:[#allocation33_spill]] }
  0x28   : > { %s258_s30 = sshll.u32 %s1642_s5, 4  ;;  %s1178_s12 = smov [#allocation12]   ;;  %s259_s30 = int_to_ptr.hbm [resolvable:$true] %s258_s30 }
  0x29   : > { %s243_s14 = sshll.u32 %s1643_s4, 4  ;;  %s275_s13 = sshll.u32 %s1178_s12, 4  ;;  %s244_s14 = int_to_ptr.hbm [resolvable:$true] %s243_s14  ;;  %s276_s13 = int_to_ptr.vmem [resolvable:$true] %s275_s13 }
  0x2a   : > { %890 = dma.hbm_to_vmem [thread:$0]  (!%p1300_p12), %s259_s30, 16, %s261_s11, [#allocation11]  }
  0x2b   : > { %887 = dma.hbm_to_vmem [thread:$0]  (!%p1300_p12), %s244_s14, 1024, %s246_s20, [#allocation8], %s1176_s22, %s1176_s22, %s1177_s23  }
  0x2c   : > { %295 = sbr.rel (%p1286_p10) target bundleno = 342 (0x156), region = 44 }
  0x2d   : > { %s273_s10 = sshll.u32 %s1645_s7, 4  ;;  %s274_s10 = int_to_ptr.hbm [resolvable:$true] %s273_s10 }
  0x2e   : > { %893 = dma.hbm_to_vmem [thread:$0]  (!%p1300_p12), %s274_s10, 16, %s276_s13, [#allocation11]  }
  0x31   : > { %1141 = dma.done.wait (%p901_p9), [#allocation8], 1024  }
  0x32   : > { %1143 = vsyncadd (%p901_p9), [#allocation8], 4294966272 }
  0x33   : > { %1145 = dma.done.wait (%p901_p9), [#allocation11], 32  }
  0x34   : > { %1147 = vsyncadd (%p901_p9), [#allocation11], 4294967264  ;;  %p341_p13 = scmp.lt.s32.totalorder %s1258_s19, 1  ;;  %s1646_s2 = sld [smem:[#allocation30_spill]]  ;;  %v389_v1 = vld [vmem:[%s1606_s6 + $0x78] sm:$0xff]  ;;  %v388_v2 = vld [vmem:[%s1606_s6 + $0x70] sm:$0xff] }
  0x35   : > { %406 = vmatpush.msra.mxu0 %v389_v1  ;;  %vm352_vm0 = vcmask 1040384   ;;  %vm354_vm1 = vcmask 516096   ;;  %s1340_s28 = sshll.u32 %s1258_s19, 7  ;;  %s1345_s12 = sld [smem:[#allocation6 + %s1258_s19]]  ;;  %v387_v9 = vld [vmem:[%s1606_s6 + $0x68] sm:$0xff]  ;;  %v386_v11 = vld [vmem:[%s1606_s6 + $0x60] sm:$0xff] }
  0x36   : > { %s342_s30 = scalar_select %p341_p13, %s1258_s19, 1  ;;  %v568_v10 = vld [vmem:[#allocation7 + $0x38] sm:$0xff]  ;;  %v567_v12 = vld [vmem:[#allocation7 + $0x30] sm:$0xff]  ;;  %v385_v13 = vld [vmem:[%s1606_s6 + $0x58] sm:$0xff]  ;;  %vm403_vm2 = vcmask 523264  }
  0x37   : > { %407 = vmatpush.msra.mxu0 %v388_v2  ;;  %s462_s29 = sadd.s32 1, %s1340_s28  ;;  %s449_s10 = sld [smem:[#allocation5 + %s1340_s28]]  ;;  %584 = vmatpush.msra.mxu2 %v568_v10  ;;  %v566_v14 = vld [vmem:[#allocation7 + $0x28] sm:$0xff]  ;;  %v384_v19 = vld [vmem:[%s1606_s6 + $0x50] sm:$0xff]  ;;  %v383_v31 = vld [vmem:[%s1606_s6 + $0x48] sm:$0xff] }
  0x38   : > { %s802_s11 = sshll.u32 %s342_s30, 1  ;;  %s463_s13 = sld [smem:[#allocation5 + %s462_s29]]  ;;  %v565_v20 = vld [vmem:[#allocation7 + $0x20] sm:$0xff]  ;;  %v564_v32 = vld [vmem:[#allocation7 + $0x18] sm:$0xff]  ;;  %v382_v41 = vld [vmem:[%s1606_s6 + $0x40] sm:$0xff] }
  0x39   : > { %s476_s30 = sadd.s32 2, %s1340_s28  ;;  %s504_s20 = sadd.s32 4, %s1340_s28  ;;  %408 = vmatpush.msra.mxu0 %v387_v9  ;;  %585 = vmatpush.msra.mxu2 %v567_v12  ;;  %v563_v42 = vld [vmem:[#allocation7 + $0x10] sm:$0xff]  ;;  %v381_v45 = vld [vmem:[%s1606_s6 + $0x38] sm:$0xff]  ;;  %v380_v48 = vld [vmem:[%s1606_s6 + $0x30] sm:$0xff] }
  0x3a   : > { %s344_s15 = scalar_lea.vmem %s1646_s2, %s802_s11  ;;  %s490_s11 = sadd.s32 3, %s1340_s28  ;;  %v397_v46 = vld [vmem:[%s1606_s6 + $0xb8] sm:$0xff]  ;;  %v396_v49 = vld [vmem:[%s1606_s6 + $0xb0] sm:$0xff]  ;;  %v379_v51 = vld [vmem:[%s1606_s6 + $0x28] sm:$0xff] }
  0x3b   : > { %v1328_v0 = vld [vmem:[%s344_s15] sm:$0x3]  ;;  %p456_p1 = scmp.gt.s32.totalorder %s1345_s12, 0  ;;  %s477_s14 = sld [smem:[#allocation5 + %s476_s30]]  ;;  %409 = vmatpush.msra.mxu0 %v386_v11  ;;  %586 = vmatpush.msra.mxu2 %v566_v14  ;;  %v562_v47 = vld [vmem:[#allocation7 + $0x8] sm:$0xff]  ;;  %v561_v50 = vld [vmem:[#allocation7] sm:$0xff] }
  0x3c   : > { %v346_v3 = vmul.f32 %v1328_v0, %v1328_v0  ;;  %p470_p3 = scmp.gt.s32.totalorder %s1345_s12, 1  ;;  %s491_s27 = sld [smem:[#allocation5 + %s490_s11]]  ;;  %434 = vmatpush.msra.mxu1 %v397_v46  ;;  %v395_v52 = vld [vmem:[%s1606_s6 + $0xa8] sm:$0xff]  ;;  %v378_v53 = vld [vmem:[%s1606_s6 + $0x20] sm:$0xff]  ;;  %v377_v55 = vld [vmem:[%s1606_s6 + $0x18] sm:$0xff] }
  0x3d   : > { %p450_p0 = scmp.gt.s32.totalorder %s449_s10, 0  ;;  %p805_p4 = scmp.lt.s32.totalorder %s449_s10, 127  ;;  %410 = vmatpush.msra.mxu0 %v385_v13  ;;  %587 = vmatpush.msra.mxu2 %v565_v20  ;;  %v394_v54 = vld [vmem:[%s1606_s6 + $0xa0] sm:$0xff]  ;;  %v393_v56 = vld [vmem:[%s1606_s6 + $0x98] sm:$0xff]  ;;  %v376_v57 = vld [vmem:[%s1606_s6 + $0x10] sm:$0xff] }
  0x3e   : > { %v348_v4 = vperm.slane %v346_v3, 0  ;;  %v349_v5 = vperm.slane %v346_v3, 1  ;;  %p464_p2 = scmp.gt.s32.totalorder %s463_s13, 0  ;;  %p810_p7 = scmp.lt.s32.totalorder %s463_s13, 127  ;;  %435 = vmatpush.msra.mxu1 %v396_v49  ;;  %v392_v58 = vld [vmem:[%s1606_s6 + $0x90] sm:$0xff]  ;;  %v375_v60 = vld [vmem:[%s1606_s6 + $0x8] sm:$0xff] }
  0x3f   : > { %s1671_s10 = smov (!%p450_p0, %s449_s10), 0  ;;  %p484_p9 = scmp.gt.s32.totalorder %s1345_s12, 2  ;;  %411 = vmatpush.msra.mxu0 %v384_v19  ;;  %588 = vmatpush.msra.mxu2 %v564_v32  ;;  %v391_v61 = vld [vmem:[%s1606_s6 + $0x88] sm:$0xff]  ;;  %v374_v62 = vld [vmem:[%s1606_s6] sm:$0xff]  ;;  %v949_v14 = vld [vmem:[#allocation10] ss:$0 sm:$0xff] }
  0x40   : > { %v353_v6 = vsel %vm352_vm0, %v348_v4, 0.0  ;;  %v355_v7 = vsel %vm354_vm1, %v349_v5, 0.0  ;;  %s1351_s15 = scalar_select %p456_p1, 1, 0  ;;  %436 = vmatpush.msra.mxu1 %v395_v52  ;;  %v390_v63 = vld [vmem:[%s1606_s6 + $0x80] sm:$0xff] }
  0x41   : > { %v356_v8 = vadd.f32 %v355_v7, %v353_v6  ;;  %s465_s16 = scalar_select %p464_p2, %s463_s13, 0  ;;  %412 = vmatpush.msra.mxu0 %v383_v31  ;;  %589 = vmatpush.msra.mxu2 %v563_v42 }
  0x42   : > { %s1673_s10 = smov (!%p805_p4, %s1671_s10), 127  ;;  %p478_p8 = scmp.gt.s32.totalorder %s477_s14, 0  ;;  %437 = vmatpush.msra.mxu1 %v394_v54 }
  0x43   : > { %357 = vadd.xlane.f32.xlu0 %v356_v8  ;;  %s1356_s22 = scalar_select %p470_p3, 1, 0  ;;  %413 = vmatpush.msra.mxu0 %v382_v41 }
  0x44   : > { %s1675_s16 = smov (!%p810_p7, %s465_s16), 127  ;;  %p492_p10 = scmp.gt.s32.totalorder %s491_s27, 0  ;;  %590 = vmatpush.msra.mxu2 %v562_v47  ;;  %438 = vmatpush.msra.mxu1 %v393_v56 }
  0x45   : > { %p815_p11 = scmp.lt.s32.totalorder %s477_s14, 127  ;;  %s505_s29 = sld [smem:[#allocation5 + %s504_s20]]  ;;  %414 = vmatpush.msra.mxu0 %v381_v45 }
  0x46   : > { %s1677_s14 = smov (!%p478_p8, %s477_s14), 0  ;;  %p820_p12 = scmp.lt.s32.totalorder %s491_s27, 127  ;;  %591 = vmatpush.msra.mxu2 %v561_v50  ;;  %439 = vmatpush.msra.mxu1 %v392_v58 }
  0x47   : > { %s1679_s27 = smov (!%p492_p10, %s491_s27), 0  ;;  %s1681_s14 = smov (!%p815_p11, %s1677_s14), 127  ;;  %415 = vmatpush.msra.mxu0 %v380_v48 }
  0x48   : > { %s1366_s2 = scalar_select %p484_p9, 1, 0  ;;  %440 = vmatpush.msra.mxu1 %v391_v61 }
  0x49   : > { %p498_p13 = scmp.gt.s32.totalorder %s1345_s12, 3  ;;  %s518_s23 = sadd.s32 5, %s1340_s28  ;;  %416 = vmatpush.msra.mxu0 %v379_v51 }
  0x4a   : > { %s1683_s27 = smov (!%p820_p12, %s1679_s27), 127  ;;  %s1379_s30 = sld [smem:[#allocation5 + %s518_s23]]  ;;  %441 = vmatpush.msra.mxu1 %v390_v63 }
  0x4b   : > { %p506_p0 = scmp.gt.s32.totalorder %s505_s29, 0  ;;  %p512_p1 = scmp.gt.s32.totalorder %s1345_s12, 4  ;;  %417 = vmatpush.msra.mxu0 %v378_v53 }
  0x4c   : > { %s1381_s11 = scalar_select %p498_p13, 1, 0 }
  0x4d   : > { %s532_s7 = sadd.s32 6, %s1340_s28  ;;  %s546_s21 = sadd.s32 7, %s1340_s28  ;;  %418 = vmatpush.msra.mxu0 %v377_v55 }
  0x4e   : > { %s507_s24 = scalar_select %p506_p0, %s505_s29, 0 }
  0x4f   : > { %p825_p2 = scmp.lt.s32.totalorder %s505_s29, 127  ;;  %s533_s20 = sld [smem:[#allocation5 + %s532_s7]]  ;;  %419 = vmatpush.msra.mxu0 %v376_v57 }
  0x50   : > { %s1387_s26 = scalar_select %p512_p1, 1, 0 }
  0x51   : > { %p526_p3 = scmp.gt.s32.totalorder %s1345_s12, 5  ;;  %s547_s4 = sld [smem:[#allocation5 + %s546_s21]]  ;;  %420 = vmatpush.msra.mxu0 %v375_v60 }
  0x52   : > { %p520_p4 = scmp.gt.s32.totalorder %s1379_s30, 0  ;;  %s1685_s24 = smov (!%p825_p2, %s507_s24), 127 }
  0x53   : > { %p540_p7 = scmp.gt.s32.totalorder %s1345_s12, 6  ;;  %p830_p10 = scmp.lt.s32.totalorder %s1379_s30, 127  ;;  %421 = vmatpush.msra.mxu0 %v374_v62 }
  0x54   : > { %s1402_s7 = scalar_select %p526_p3, 1, 0 }
  0x55   : > { %s521_s29 = scalar_select %p520_p4, %s1379_s30, 0 }
  0x56   : > { %p534_p8 = scmp.gt.s32.totalorder %s533_s20, 0  ;;  %p835_p11 = scmp.lt.s32.totalorder %s533_s20, 127 }
  0x57   : > { %s1406_s9 = scalar_select %p540_p7, 1, 0 }
  0x58   : > { %p548_p9 = scmp.gt.s32.totalorder %s547_s4, 0  ;;  %s1687_s20 = smov (!%p534_p8, %s533_s20), 0 }
  0x59   : > { %p840_p12 = scmp.lt.s32.totalorder %s547_s4, 127  ;;  %p554_p13 = scmp.gt.s32.totalorder %s1345_s12, 7 }
  0x5a   : > { %s1689_s4 = smov (!%p548_p9, %s547_s4), 0  ;;  %s1691_s29 = smov (!%p830_p10, %s521_s29), 127 }
  0x5b   : > { %s1693_s20 = smov (!%p835_p11, %s1687_s20), 127  ;;  %s1695_s4 = smov (!%p840_p12, %s1689_s4), 127 }
  0x5c   : > { %s1418_s30 = scalar_select %p554_p13, 1, 0 }
  0x5d   : > { %s510_s18 = scalar_lea.vmem %s1603_s3, %s1685_s24  ;;  %s524_s13 = scalar_lea.vmem %s1603_s3, %s1691_s29 }
  0x5e   : > { %s1647_s24 = scalar_lea.vmem %s1603_s3, %s1673_s10  ;;  %s1648_s0 = scvt.s32.f32 %s1351_s15  ;;  %v511_v28 = vld [vmem:[%s510_s18] sm:$0x1] }
  0x5f   : > { %v455_v15 = vld [vmem:[%s1647_s24] sm:$0x1]  ;;  %s1649_s21 = scalar_lea.vmem %s1603_s3, %s1675_s16  ;;  %s1650_s5 = scvt.s32.f32 %s1356_s22 }
  0x60   : > { %v459_v16 = vstv %s1648_s0  ;;  %v469_v17 = vld [vmem:[%s1649_s21] sm:$0x1]  ;;  %s538_s25 = scalar_lea.vmem %s1603_s3, %s1693_s20  ;;  %s556_s19 = scvt.s32.f32 %s1418_s30 }
  0x61   : > { %v473_v18 = vstv %s1650_s5  ;;  %v460_v21 = vmul.f32 %v459_v16, %v455_v15  ;;  %s1651_s16 = scalar_lea.vmem %s1603_s3, %s1681_s14  ;;  %s1652_s22 = scvt.s32.f32 %s1366_s2  ;;  %v525_v30 = vld [vmem:[%s524_s13] sm:$0x1] }
  0x62   : > { %v474_v22 = vmul.f32 %v473_v18, %v469_v17  ;;  %v483_v23 = vld [vmem:[%s1651_s16] sm:$0x1]  ;;  %s1653_s21 = scvt.s32.f32 %s1381_s11  ;;  %s552_s30 = scalar_lea.vmem %s1603_s3, %s1695_s4  ;;  %v557_v40 = vstv %s556_s19 }
  0x63   : > { %v487_v24 = vstv %s1652_s22  ;;  %s1654_s0 = scalar_lea.vmem %s1603_s3, %s1683_s27  ;;  %s1655_s14 = scvt.s32.f32 %s1387_s26  ;;  %461 = vst.msk [vmem:[#allocation2] sm:$0x1] %vm354_vm1, %v460_v21  ;;  %v539_v36 = vld [vmem:[%s538_s25] sm:$0x1] }
  0x64   : > { %v501_v25 = vstv %s1653_s21  ;;  %v488_v26 = vmul.f32 %v487_v24, %v483_v23  ;;  %v497_v27 = vld [vmem:[%s1654_s0] sm:$0x1]  ;;  %s1656_s4 = scvt.s32.f32 %s1402_s7  ;;  %s1657_s1 = scvt.s32.f32 %s1406_s9  ;;  %475 = vst.msk [vmem:[#allocation2 + $0x1] sm:$0x1] %vm354_vm1, %v474_v22 }
  0x65   : > { %v515_v29 = vstv %s1655_s14  ;;  %v502_v33 = vmul.f32 %v501_v25, %v497_v27  ;;  %v553_v39 = vld [vmem:[%s552_s30] sm:$0x1]  ;;  %s1658_s7 = sld [smem:[#allocation22_spill]] }
  0x66   : > { %v516_v34 = vmul.f32 %v515_v29, %v511_v28  ;;  %v529_v35 = vstv %s1656_s4  ;;  %v543_v37 = vstv %s1657_s1  ;;  %489 = vst.msk [vmem:[#allocation2 + $0x2] sm:$0x1] %vm354_vm1, %v488_v26  ;;  %v558_v44 = vmul.f32 %v557_v40, %v553_v39  ;;  %s1659_s19 = sld [smem:[#allocation25_spill]] }
  0x67   : > { %v530_v38 = vmul.f32 %v529_v35, %v525_v30  ;;  %v544_v43 = vmul.f32 %v543_v37, %v539_v36  ;;  %503 = vst.msk [vmem:[#allocation2 + $0x3] sm:$0x1] %vm354_vm1, %v502_v33  ;;  %s1660_s10 = sld [smem:[#allocation34_spill]] }
  0x68   : > { %517 = vst.msk [vmem:[#allocation2 + $0x4] sm:$0x1] %vm354_vm1, %v516_v34 }
  0x69   : > { %531 = vst.msk [vmem:[#allocation2 + $0x5] sm:$0x1] %vm354_vm1, %v530_v38 }
  0x6a   : > { %545 = vst.msk [vmem:[#allocation2 + $0x6] sm:$0x1] %vm354_vm1, %v544_v43 }
  0x6b   : > { %559 = vst.msk [vmem:[#allocation2 + $0x7] sm:$0x1] %vm354_vm1, %v558_v44  ;;  %s1550_s18 = sand.u32 1, %s1658_s7  }
  0x6c   : > { %s801_s28 = sshll.u32 %s1550_s18, 4  ;;  %s867_s5 = sshll.u32 %s1659_s19, 4 }
  0x6d   : > { %s334_s29 = scalar_lea.vmem [#allocation13], %s801_s28  ;;  %s645_s15 = scalar_lea.hbm %s1660_s10, %s867_s5 }
  0x6e   : > { %s646_s16 = sshll.u32 %s334_s29, 4  ;;  %s648_s21 = sshll.u32 %s645_s15, 4  ;;  %s647_s16 = int_to_ptr.vmem [resolvable:$true] %s646_s16  ;;  %s649_s21 = int_to_ptr.hbm [resolvable:$true] %s648_s21 }
  0x6f   : > { %s630_s23 = scalar_lea.sflag [#allocation9], %s1550_s18  ;;  %s1080_s20 = sshra.s32 %s649_s21, 4  ;;  %s1081_s20 = int_to_ptr.hbm [resolvable:$true] %s1080_s20 }
  0x70   : > { %s1082_s30 = scalar_lea.hbm %s1081_s20, 16  ;;  %s1086_s0 = scalar_lea.hbm %s1660_s10, 32 }
  0x71   : > { %p1083_p0 = scmp.ne.s32.totalorder %s1081_s20, %s1082_s30  ;;  %p1087_p3 = scmp.lt.s32.totalorder %s1081_s20, %s1660_s10 }
  0x72   : > { %v560_v59 = vld [vmem:[#allocation2] sm:$0xff]  ;;  %p1088_p4 = scmp.lt.s32.totalorder %s1086_s0, %s1082_s30 }
  0x73   : > { %845 = vmatmul.msk.f32.vlgmr.msra.gmra.mxu2 %vm403_vm2, %v560_v59  ;;  %p1084_p1 = pnand %p1083_p0, %p1275_p5 }
  0x74   : > { %p1089_p7 = por %p1088_p4, %p1087_p3 }
  0x75   : > { %p1085_p2 = pneg %p1084_p1 }
  0x77   : > { %p1090_p8 = pnand %p1089_p7, %p1085_p2 }
  0xb6   : > { %v358_v1 = vpop.xlane.xlu0 %357 }
  0xb7   : > { %v359_v2 = vmax.f32 %v358_v1, 1e-24 }
  0xb9   : > { %950 = vrsqrt.f32 %v359_v2  ;;  %vm366_vm4 = vweird.f32 %v359_v2 }
  0xbf   : > { %v951_v3 = vpop.eup %950 }
  0xc0   : > { %v361_v4 = vmul.f32 %v951_v3, %v359_v2  ;;  %vm367_vm3 = vweird.f32 %v951_v3 }
  0xc1   : > { %vm368_vm5 = vmor %vm366_vm4, %vm367_vm3 }
  0xc2   : > { %v362_v5 = vmul.f32 %v951_v3, %v361_v4 }
  0xc4   : > { %v363_v6 = vmul.f32 0.5, %v362_v5 }
  0xc6   : > { %v364_v7 = vsub.f32 1.5, %v363_v6 }
  0xc8   : > { %v365_v8 = vmul.f32 %v951_v3, %v364_v7 }
  0xca   : > { %v369_v9 = vsel %vm368_vm5, %v951_v3, %v365_v8 }
  0xcb   : > { %v371_v10 = vperm.slane %v369_v9, 0 }
  0xcd   : > { %v373_v11 = vmul.f32 %v371_v10, %v1328_v0 }
  0xcf   : > { %v400_v12 = vperm.slane %v373_v11, 0  ;;  %v401_v13 = vperm.slane %v373_v11, 1 }
  0xd1   : > { %422 = vmatmul.f32.vlgmr.msra.gmra.mxu0 %v400_v12  ;;  %803 = vmatmul.msk.f32.vlgmr.msra.gmra.mxu1 %vm403_vm2, %v401_v13 }
  0xf6   : > { %v593_v15 = vpop.f32.mrf.mxu2 }
  0xf7   : > { %v594_v16 = vadd.f32 %v949_v14, %v593_v15 }
  0xf9   : > { %596 = vst [vmem:[#allocation3] sm:$0xff] %v594_v16 }
 0x100   : > { %v597_v17 = vld [vmem:[#allocation3] sm:$0x1]  ;;  %v603_v19 = vld [vmem:[#allocation3 + $0x1] sm:$0x3]   ;;  %v611_v0 = vld [vmem:[#allocation3 + $0x3] sm:$0x3]  }
 0x101   : > { %v599_v18 = vld [vmem:[#allocation3] sm:$0x3]   ;;  %v607_v20 = vld [vmem:[#allocation3 + $0x2] sm:$0x3]   ;;  %598 = vst [vmem:[%s334_s29] sm:$0x1] %v597_v17 }
 0x102   : > { %600 = vst [vmem:[%s334_s29 + $0x1] sm:$0x3] %v599_v18   ;;  %v615_v21 = vld [vmem:[#allocation3 + $0x4] sm:$0x3]   ;;  %v623_v23 = vld [vmem:[#allocation3 + $0x6] sm:$0x3]  }
 0x103   : > { %604 = vst [vmem:[%s334_s29 + $0x3] sm:$0x3] %v603_v19   ;;  %v619_v22 = vld [vmem:[#allocation3 + $0x5] sm:$0x3]   ;;  %v627_v24 = vld [vmem:[#allocation3 + $0x7] sm:$0x1] }
 0x104   : > { %608 = vst [vmem:[%s334_s29 + $0x5] sm:$0x3] %v607_v20  }
 0x105   : > { %612 = vst [vmem:[%s334_s29 + $0x7] sm:$0x3] %v611_v0  }
 0x106   : > { %616 = vst [vmem:[%s334_s29 + $0x9] sm:$0x3] %v615_v21  }
 0x107   : > { %620 = vst [vmem:[%s334_s29 + $0xb] sm:$0x3] %v619_v22  }
 0x108   : > { %624 = vst [vmem:[%s334_s29 + $0xd] sm:$0x3] %v623_v23  }
 0x109   : > { %628 = vst [vmem:[%s334_s29 + $0xf] sm:$0x1] %v627_v24 }
 0x10a   : > { %1093 = shalt.err (!%p1090_p8)
}
 0x10b   : > { %s1179_s11 = smov 128   ;;  %s1180_s4 = smov 8   ;;  %v398_v25 = vld [vmem:[#allocation12] sm:$0x1] }
 0x10c   : > { %880 = dma.vmem_to_hbm [thread:$0]  (%p1275_p5), %s647_s16, 256, %s649_s21, %s630_s23, %s1179_s11, %s1179_s11, %s1180_s4  }
 0x10d   : > { %s1662_s27 = sld [smem:[#allocation35_spill]]  ;;  %s340_s25 = scalar_lea.vmem [#allocation14], %s1550_s18 }
 0x10e   : > { %s662_s13 = sshll.u32 %s340_s25, 4  ;;  %s635_s28 = scalar_lea.sflag [#allocation15], %s1550_s18  ;;  %s663_s13 = int_to_ptr.vmem [resolvable:$true] %s662_s13 }
 0x113   : > { %s660_s9 = scalar_lea.hbm %s1662_s27, %s1659_s19  ;;  %s1114_s8 = scalar_lea.hbm %s1662_s27, 2 }
 0x114   : > { %s664_s7 = sshll.u32 %s660_s9, 4  ;;  %s665_s7 = int_to_ptr.hbm [resolvable:$true] %s664_s7 }
 0x115   : > { %s1108_s5 = sshra.s32 %s665_s7, 4  ;;  %s1109_s5 = int_to_ptr.hbm [resolvable:$true] %s1108_s5 }
 0x116   : > { %s1110_s29 = scalar_lea.hbm %s1109_s5, 1  ;;  %p1115_p12 = scmp.lt.s32.totalorder %s1109_s5, %s1662_s27 }
 0x117   : > { %p1111_p9 = scmp.ne.s32.totalorder %s1109_s5, %s1110_s29  ;;  %p1116_p13 = scmp.lt.s32.totalorder %s1114_s8, %s1110_s29 }
 0x119   : > { %p1112_p10 = pnand %p1111_p9, %p1275_p5  ;;  %p1117_p0 = por %p1116_p13, %p1115_p12 }
 0x11b   : > { %p1113_p11 = pneg %p1112_p10 }
 0x11d   : > { %p1118_p1 = pnand %p1117_p0, %p1113_p11 }
 0x14e   : > { %v423_v26 = vpop.f32.mrf.mxu0  ;;  %v443_v28 = vpop.f32.mrf.mxu1 }
 0x14f   : > { %v424_v27 = vadd.f32 %v423_v26, %v398_v25 }
 0x151   : > { %v444_v29 = vadd.f32 %v443_v28, %v424_v27 }
 0x153   : > { %446 = vst [vmem:[%s340_s25] sm:$0x1] %v444_v29 }
 0x154   : > { %1121 = shalt.err (!%p1118_p1)
}
 0x155   : > { %881 = dma.vmem_to_hbm [thread:$0]  (%p1275_p5), %s663_s13, 16, %s665_s7, %s635_s28  }
 0x156 PF: > { %s1663_s18 = sld [smem:[#allocation24_spill]] }
 0x157   : > { %s1664_s21 = sld [smem:[#allocation21_spill]] }
 0x15c   : > { %p907_p2 = scmp.ge.s32.totalorder %s1663_s18, 2 }
 0x15d   : > { %s676_s20 = sand.u32 1, %s1664_s21  }
 0x15e   : > { %p895_p3 = pnand %p907_p2, %p1279_p6  ;;  %s677_s30 = scalar_lea.sflag [#allocation9], %s676_s20 }
 0x160   : > { %p896_p4 = pneg %p895_p3 }
 0x162   : > { %1149 = dma.done.wait (%p896_p4), %s677_s30, 256  }
 0x163   : > { %1151 = vsyncadd (%p896_p4), %s677_s30, 4294967040  ;;  %s687_s17 = scalar_lea.sflag [#allocation15], %s676_s20 }
 0x164   : > { %1153 = dma.done.wait (%p896_p4), %s687_s17, 16  }
 0x165   : > { %1155 = vsyncadd (%p896_p4), %s687_s17, 4294967280  ;;  %s1666_s18 = sld [smem:[#allocation26_spill]] }
 0x166   : > { %s1667_s0 = sld [smem:[#allocation22_spill]] }
 0x167   : > { %s1668_s17 = sld [smem:[#allocation23_spill]] }
 0x168   : > { %s1669_s1 = sld [smem:[#allocation27_spill]] }
 0x16b   : > { %p38_p5 = scmp.ge.s32.totalorder %s1666_s18, 4  }
 0x16d   :  { %40 = sbr.rel (!%p38_p5) target bundleno = 19 (0x13), region = 117 }
 0x172   :  { %692 = vsyncpa [#allocation8], 1 }
 0x173   :  { %694 = vsyncpa [#allocation8 + $0x1], 1 }
 0x174   :  { %695 = vsyncpa [#allocation11], 1 }
 0x175   :  { %696 = vsyncpa [#allocation9], 1 }
 0x176   :  { %698 = vsyncpa [#allocation9 + $0x1], 1 }
 0x177   :  { %699 = vsyncpa [#allocation15], 1 }
 0x178   :  { %701 = vsyncpa [#allocation15 + $0x1], 1 }

</bundles_post_ra>
